<compile_context>
chip_gen: v7x
topology: tpu7x:2x2x1
jax: 0.10.0
libtpu: 0.0.40
codegen_flags: <defaults>
</compile_context>

<pallas_src>
import functools

import jax
import jax.numpy as jnp
from jax.experimental import pallas as pl
from jax.experimental.pallas import tpu as pltpu


def ncf_kernel(
    uidx_ref, iidx_ref,            # (1, TB) int32 indices (batch on lanes)
    dense_ref,                     # (D, TB)  dense features, feature-major
    table_ref,                     # (2*(F+H0), U+I) block-diagonal gather table
    b0_ref,                        # (H0, 1)
    w1_ref, b1_ref,                # (H1, H0), (H1, 1)
    w2_ref, b2_ref,                # (H2, H1), (H2, 1)
    wpm_ref, wpd_ref,              # (H2, 1), (D, 1)
    bp_ref,                        # (1, 1)
    out_ref,                       # (1, TB)
    *, F, H0, U,
):
    f32 = jnp.float32
    TB = uidx_ref.shape[1]
    V = table_ref.shape[1]          # U + I

    # --- fused gather: ONE one-hot matmul against the block-diagonal table ---
    # Each column has exactly two ones: row u (user block) and row U+i (item
    # block); the block-diagonal zeros keep the two contributions separate.
    # NOTE: out-of-range indices silently yield all-zero rows (valid inputs ok).
    rows = jax.lax.broadcasted_iota(jnp.int32, (V, TB), 0)
    u = uidx_ref[...]                                             # (1, TB)
    it = iidx_ref[...] + U                                        # (1, TB)
    oh = ((rows == u) | (rows == it)).astype(f32)                 # (V, TB)

    g = jnp.dot(table_ref[...], oh, preferred_element_type=f32)   # (2(F+H0), TB)
    gmf_u = g[:F]                     # wpg-prescaled user-GMF rows      (F, TB)
    h_u = g[F:F + H0]                 # w0u @ embed_user_MLP gather     (H0, TB)
    gmf_i = g[F + H0:2 * F + H0]      # item-GMF rows                    (F, TB)
    h_i = g[2 * F + H0:]              # w0i @ embed_item_MLP gather     (H0, TB)

    # --- predict partials that don't need the MLP: reduce early to (1, TB) ---
    partial = (jnp.sum(gmf_u * gmf_i, axis=0, keepdims=True)
               + jnp.sum(dense_ref[...] * wpd_ref[...], axis=0, keepdims=True)
               + bp_ref[...])                                     # (1, TB)

    # --- MLP branch (layer 0 already folded into the gather table) ---
    h = jnp.maximum(h_u + h_i + b0_ref[...], 0.0)                 # (H0, TB)
    h = jnp.maximum(
        jnp.dot(w1_ref[...], h, preferred_element_type=f32) + b1_ref[...], 0.0)
    h = jnp.maximum(
        jnp.dot(w2_ref[...], h, preferred_element_type=f32) + b2_ref[...], 0.0)

    out = partial + jnp.sum(h * wpm_ref[...], axis=0, keepdims=True)   # (1, TB)
    out_ref[...] = out.astype(out_ref.dtype)


def prepare_params(params, num_layers=3):
    """One-time feature-major packing (hoisted out of the per-call hot path)."""
    assert num_layers == 3, "kernel is specialized for num_layers == 3"
    F = params["embed_user_GMF"].shape[1]
    M = params["embed_user_MLP"].shape[1]
    U = params["embed_user_GMF"].shape[0]
    I = params["embed_item_GMF"].shape[0]

    w0 = params["mlp_w0"]                      # (H0, 2M)
    H0 = w0.shape[0]
    w0u, w0i = w0[:, :M], w0[:, M:]
    w2 = params["mlp_w2"]
    H2 = w2.shape[0]
    wp = params["predict_w"]                   # (1, F + H2 + D)
    wpg = wp[:, :F]                            # (1, F)
    wpm = wp[:, F:F + H2].T                    # (H2, 1)
    wpd = wp[:, F + H2:].T                     # (D, 1)

    # Block-diagonal gather table, shape (2*(F+H0), U+I):
    #   rows [0, F)          : wpg-prescaled user-GMF embeddings   (F, U)
    #   rows [F, F+H0)       : w0u @ embed_user_MLP.T              (H0, U)
    #   rows [F+H0, 2F+H0)   : item-GMF embeddings                 (F, I)
    #   rows [2F+H0, ...)    : w0i @ embed_item_MLP.T              (H0, I)
    user_block = jnp.concatenate(
        [params["embed_user_GMF"].T * wpg.T,
         w0u @ params["embed_user_MLP"].T], axis=0)                # (F+H0, U)
    item_block = jnp.concatenate(
        [params["embed_item_GMF"].T,
         w0i @ params["embed_item_MLP"].T], axis=0)                # (F+H0, I)
    R = F + H0
    table = jnp.zeros((2 * R, U + I), jnp.float32)
    table = table.at[:R, :U].set(user_block)
    table = table.at[R:, U:].set(item_block)

    return {
        "table": table,
        "b0": params["mlp_b0"].reshape(-1, 1),
        "w1": params["mlp_w1"], "b1": params["mlp_b1"].reshape(-1, 1),
        "w2": w2, "b2": params["mlp_b2"].reshape(-1, 1),
        "wpm": wpm, "wpd": wpd,
        "bp": params["predict_b"].reshape(1, 1),
    }


@functools.partial(jax.jit, static_argnames=("num_users", "tb"))
def ncf_forward(packed, user, item, dense_features, *, num_users, tb=1024):
    """NeuMF-end forward. user/item: int32 [B]; dense_features: f32 [B, D].

    Returns f32 [B, 1] (same as the PyTorch module).
    """
    B = user.shape[0]
    D = dense_features.shape[1]
    H0 = packed["w1"].shape[1]
    F = packed["table"].shape[0] // 2 - H0

    # --- batch tiling: lanes padded to a multiple of 128; grid >= 2 whenever
    # the batch spans >= 2 lane-chunks (both v7x TensorCores busy). ---
    tb = max(128, ((tb + 127) // 128) * 128)
    n128 = (B + 127) // 128                        # 128-lane chunks in batch
    chunks = min(tb // 128, max(1, n128 // 2))     # chunks per tile
    TB = 128 * chunks
    grid = (n128 + chunks - 1) // chunks
    Bp = TB * grid
    pad = Bp - B

    # Pad tail with index 0 (always valid) / zero dense rows; rows discarded.
    user_p = jnp.pad(user.astype(jnp.int32), (0, pad)).reshape(1, Bp)
    item_p = jnp.pad(item.astype(jnp.int32), (0, pad)).reshape(1, Bp)
    dense_p = jnp.pad(dense_features.astype(jnp.float32), ((0, pad), (0, 0))).T

    lane = lambda shape: pl.BlockSpec(shape, lambda i: (0, i))    # batch on lanes
    full = lambda arr: pl.BlockSpec(arr.shape, lambda i: (0, 0))  # VMEM-resident

    kern = functools.partial(ncf_kernel, F=F, H0=H0, U=num_users)
    out = pl.pallas_call(
        kern,
        out_shape=jax.ShapeDtypeStruct((1, Bp), jnp.float32),
        grid_spec=pltpu.PrefetchScalarGridSpec(
            num_scalar_prefetch=0,
            grid=(grid,),
            in_specs=[
                lane((1, TB)), lane((1, TB)), lane((D, TB)),
                full(packed["table"]),
                full(packed["b0"]),
                full(packed["w1"]), full(packed["b1"]),
                full(packed["w2"]), full(packed["b2"]),
                full(packed["wpm"]), full(packed["wpd"]), full(packed["bp"]),
            ],
            out_specs=lane((1, TB)),
        ),
        compiler_params=pltpu.CompilerParams(
            dimension_semantics=("parallel",)),
    )(user_p, item_p, dense_p,
      packed["table"], packed["b0"],
      packed["w1"], packed["b1"], packed["w2"], packed["b2"],
      packed["wpm"], packed["wpd"], packed["bp"])

    return out[:, :B].T                                           # (B, 1)


def init_params(key, user_num, item_num, dense_feature_size, factor_num, num_layers):
    """Deterministic init mimicking NCF._init_weight_ (model != 'NeuMF-pre')."""
    ks = jax.random.split(key, 16)
    mlp_emb_dim = factor_num * 2 ** (num_layers - 1)

    def xavier_uniform(k, shape):  # shape = (out, in)
        fan_out, fan_in = shape
        bound = (6.0 / (fan_in + fan_out)) ** 0.5
        return jax.random.uniform(k, shape, jnp.float32, -bound, bound)

    def kaiming_uniform_a1(k, shape):  # a=1, sigmoid -> gain=1
        fan_in = shape[1]
        bound = (3.0 / fan_in) ** 0.5
        return jax.random.uniform(k, shape, jnp.float32, -bound, bound)

    params = {
        "embed_user_GMF": 0.01 * jax.random.normal(ks[0], (user_num, factor_num), jnp.float32),
        "embed_item_GMF": 0.01 * jax.random.normal(ks[1], (item_num, factor_num), jnp.float32),
        "embed_user_MLP": 0.01 * jax.random.normal(ks[2], (user_num, mlp_emb_dim), jnp.float32),
        "embed_item_MLP": 0.01 * jax.random.normal(ks[3], (item_num, mlp_emb_dim), jnp.float32),
    }
    for i in range(num_layers):
        in_size = factor_num * 2 ** (num_layers - i)
        out_size = in_size // 2
        params[f"mlp_w{i}"] = xavier_uniform(ks[4 + i], (out_size, in_size))
        params[f"mlp_b{i}"] = jnp.zeros((out_size,), jnp.float32)
    predict_size = factor_num * 2 + dense_feature_size  # NeuMF
    params["predict_w"] = kaiming_uniform_a1(ks[10], (1, predict_size))
    params["predict_b"] = jnp.zeros((1,), jnp.float32)
    return params


def ncf_reference(params, user, item, dense_features, num_layers=3):
    """Pure-JAX reference (mirrors the PyTorch forward for model='NeuMF-end')."""
    eu_gmf = params["embed_user_GMF"][user]
    ei_gmf = params["embed_item_GMF"][item]
    output_gmf = eu_gmf * ei_gmf
    eu_mlp = params["embed_user_MLP"][user]
    ei_mlp = params["embed_item_MLP"][item]
    x = jnp.concatenate([eu_mlp, ei_mlp], axis=1)
    for i in range(num_layers):
        x = jnp.maximum(x @ params[f"mlp_w{i}"].T + params[f"mlp_b{i}"], 0.0)
    concat = jnp.concatenate([output_gmf, x, dense_features], axis=1)
    return concat @ params["predict_w"].T + params["predict_b"]


if __name__ == "__main__":
    # Small config: user_num=32, item_num=64, dense_feature_size=8,
    # factor_num=16, num_layers=3, model='NeuMF-end'.
    USER_NUM, ITEM_NUM, DENSE, FACTOR, LAYERS = 32, 64, 8, 16, 3

    key = jax.random.PRNGKey(0)
    pkey, u1, i1, d1, u2, i2, d2, u3, i3, d3 = jax.random.split(key, 10)
    params = init_params(pkey, USER_NUM, ITEM_NUM, DENSE, FACTOR, LAYERS)
    packed = prepare_params(params, LAYERS)   # one-time packing, off hot path

    def check(uk, ik, dk, B, name, **kw):
        user = jax.random.randint(uk, (B,), 0, USER_NUM, dtype=jnp.int32)
        item = jax.random.randint(ik, (B,), 0, ITEM_NUM, dtype=jnp.int32)
        dense = jax.random.normal(dk, (B, DENSE), jnp.float32)
        out = jax.block_until_ready(
            ncf_forward(packed, user, item, dense, num_users=USER_NUM, **kw))
        ref = ncf_reference(params, user, item, dense, LAYERS)
        assert out.shape == (B, 1), f"bad shape {name}"
        assert jnp.allclose(out, ref, atol=2e-5, rtol=2e-5), f"mismatch {name}"

    # case 1: tiny batch -> single 128-lane tile (lane-padded, unmasked stores)
    check(u1, i1, d1, 8, "B=8")
    # case 2: non-multiple batch -> TB=128, grid=3 (exercises multi-tile + pad)
    check(u2, i2, d2, 300, "B=300")
    # case 3: larger batch -> TB=512, grid=2 (exercises multi-chunk tiles)
    check(u3, i3, d3, 1000, "B=1000")

    print("KERNEL_OK")
</pallas_src>

<mosaic_0001>
module attributes {stable_mosaic.version = 11 : i64} {
  func.func @ncf_kernel(%arg0: i32, %arg1: memref<1x128xi32, #tpu.memory_space<vmem>>, %arg2: memref<1x128xi32, #tpu.memory_space<vmem>>, %arg3: memref<8x128xf32, #tpu.memory_space<vmem>>, %arg4: memref<160x96xf32, #tpu.memory_space<vmem>>, %arg5: memref<64x1xf32, #tpu.memory_space<vmem>>, %arg6: memref<32x64xf32, #tpu.memory_space<vmem>>, %arg7: memref<32x1xf32, #tpu.memory_space<vmem>>, %arg8: memref<16x32xf32, #tpu.memory_space<vmem>>, %arg9: memref<16x1xf32, #tpu.memory_space<vmem>>, %arg10: memref<16x1xf32, #tpu.memory_space<vmem>>, %arg11: memref<8x1xf32, #tpu.memory_space<vmem>>, %arg12: memref<1x1xf32, #tpu.memory_space<vmem>>, %arg13: memref<1x128xf32, #tpu.memory_space<vmem>>) attributes {dimension_semantics = [#tpu.dimension_semantics<parallel>], iteration_bounds = array<i64: 1>, scalar_prefetch = 0 : i64, scratch_operands = 0 : i64, tpu.core_type = #tpu.core_type<tc>, window_params = [{transform_indices = @transform_0, window_bounds = array<i64: 1, 128>}, {transform_indices = @transform_1, window_bounds = array<i64: 1, 128>}, {transform_indices = @transform_2, window_bounds = array<i64: 8, 128>}, {pipeline_mode = #tpu.pipeline_mode<synchronous>, transform_indices = @transform_3, window_bounds = array<i64: 160, 96>}, {pipeline_mode = #tpu.pipeline_mode<synchronous>, transform_indices = @transform_4, window_bounds = array<i64: 64, 1>}, {pipeline_mode = #tpu.pipeline_mode<synchronous>, transform_indices = @transform_5, window_bounds = array<i64: 32, 64>}, {pipeline_mode = #tpu.pipeline_mode<synchronous>, transform_indices = @transform_6, window_bounds = array<i64: 32, 1>}, {pipeline_mode = #tpu.pipeline_mode<synchronous>, transform_indices = @transform_7, window_bounds = array<i64: 16, 32>}, {pipeline_mode = #tpu.pipeline_mode<synchronous>, transform_indices = @transform_8, window_bounds = array<i64: 16, 1>}, {pipeline_mode = #tpu.pipeline_mode<synchronous>, transform_indices = @transform_9, window_bounds = array<i64: 16, 1>}, {pipeline_mode = #tpu.pipeline_mode<synchronous>, transform_indices = @transform_10, window_bounds = array<i64: 8, 1>}, {pipeline_mode = #tpu.pipeline_mode<synchronous>, transform_indices = @transform_11, window_bounds = array<i64: 1, 1>}, {transform_indices = @transform_12, window_bounds = array<i64: 1, 128>}]} {
    %0 = tpu.iota {dimensions = array<i32: 0>} : vector<96x128xi32>
    %c0 = arith.constant 0 : index
    %c0_0 = arith.constant 0 : index
    %1 = vector.load %arg1[%c0, %c0_0] : memref<1x128xi32, #tpu.memory_space<vmem>>, vector<1x128xi32>
    %c0_1 = arith.constant 0 : index
    %c0_2 = arith.constant 0 : index
    %2 = vector.load %arg2[%c0_1, %c0_2] : memref<1x128xi32, #tpu.memory_space<vmem>>, vector<1x128xi32>
    %c32_i32 = arith.constant 32 : i32
    %3 = vector.broadcast %c32_i32 : i32 to vector<1x128xi32>
    %4 = arith.addi %2, %3 : vector<1x128xi32>
    %5 = vector.broadcast %1 : vector<1x128xi32> to vector<96x128xi32>
    %6 = arith.cmpi eq, %0, %5 : vector<96x128xi32>
    %7 = vector.broadcast %4 : vector<1x128xi32> to vector<96x128xi32>
    %8 = arith.cmpi eq, %0, %7 : vector<96x128xi32>
    %9 = arith.ori %6, %8 : vector<96x128xi1>
    %10 = arith.extui %9 : vector<96x128xi1> to vector<96x128xi32>
    %11 = arith.sitofp %10 : vector<96x128xi32> to vector<96x128xf32>
    %c0_3 = arith.constant 0 : index
    %c0_4 = arith.constant 0 : index
    %12 = vector.load %arg4[%c0_3, %c0_4] : memref<160x96xf32, #tpu.memory_space<vmem>>, vector<160x96xf32>
    %cst = arith.constant dense<0.000000e+00> : vector<160x128xf32>
    %13 = tpu.matmul %12, %11, %cst {dimension_numbers = #tpu.dot_dimension_numbers<[1], [0], [0], [1], [0, 0, 1, 1], [], []>} : vector<160x96xf32>, vector<96x128xf32>, vector<160x128xf32> -> vector<160x128xf32>
    %14 = vector.extract_strided_slice %13 {offsets = [0, 0], sizes = [16, 128], strides = [1, 1]} : vector<160x128xf32> to vector<16x128xf32>
    %15 = vector.extract_strided_slice %13 {offsets = [16, 0], sizes = [64, 128], strides = [1, 1]} : vector<160x128xf32> to vector<64x128xf32>
    %16 = vector.extract_strided_slice %13 {offsets = [80, 0], sizes = [16, 128], strides = [1, 1]} : vector<160x128xf32> to vector<16x128xf32>
    %17 = vector.extract_strided_slice %13 {offsets = [96, 0], sizes = [64, 128], strides = [1, 1]} : vector<160x128xf32> to vector<64x128xf32>
    %18 = arith.mulf %14, %16 : vector<16x128xf32>
    %cst_5 = arith.constant dense<0.000000e+00> : vector<128xf32>
    %19 = vector.multi_reduction <add>, %18, %cst_5 [0] : vector<16x128xf32> to vector<128xf32>
    %20 = vector.shape_cast %19 : vector<128xf32> to vector<1x128xf32>
    %c0_6 = arith.constant 0 : index
    %c0_7 = arith.constant 0 : index
    %21 = vector.load %arg3[%c0_6, %c0_7] : memref<8x128xf32, #tpu.memory_space<vmem>>, vector<8x128xf32>
    %c0_8 = arith.constant 0 : index
    %c0_9 = arith.constant 0 : index
    %22 = vector.load %arg11[%c0_8, %c0_9] : memref<8x1xf32, #tpu.memory_space<vmem>>, vector<8x1xf32>
    %23 = vector.broadcast %22 : vector<8x1xf32> to vector<8x128xf32>
    %24 = arith.mulf %21, %23 : vector<8x128xf32>
    %cst_10 = arith.constant dense<0.000000e+00> : vector<128xf32>
    %25 = vector.multi_reduction <add>, %24, %cst_10 [0] : vector<8x128xf32> to vector<128xf32>
    %26 = vector.shape_cast %25 : vector<128xf32> to vector<1x128xf32>
    %27 = arith.addf %20, %26 : vector<1x128xf32>
    %c0_11 = arith.constant 0 : index
    %c0_12 = arith.constant 0 : index
    %28 = vector.load %arg12[%c0_11, %c0_12] : memref<1x1xf32, #tpu.memory_space<vmem>>, vector<1x1xf32>
    %29 = vector.broadcast %28 : vector<1x1xf32> to vector<1x128xf32>
    %30 = arith.addf %27, %29 : vector<1x128xf32>
    %31 = arith.addf %15, %17 : vector<64x128xf32>
    %c0_13 = arith.constant 0 : index
    %c0_14 = arith.constant 0 : index
    %32 = vector.load %arg5[%c0_13, %c0_14] : memref<64x1xf32, #tpu.memory_space<vmem>>, vector<64x1xf32>
    %33 = vector.broadcast %32 : vector<64x1xf32> to vector<64x128xf32>
    %34 = arith.addf %31, %33 : vector<64x128xf32>
    %cst_15 = arith.constant 0.000000e+00 : f32
    %35 = vector.broadcast %cst_15 : f32 to vector<64x128xf32>
    %36 = arith.maximumf %34, %35 : vector<64x128xf32>
    %c0_16 = arith.constant 0 : index
    %c0_17 = arith.constant 0 : index
    %37 = vector.load %arg6[%c0_16, %c0_17] : memref<32x64xf32, #tpu.memory_space<vmem>>, vector<32x64xf32>
    %cst_18 = arith.constant dense<0.000000e+00> : vector<32x128xf32>
    %38 = tpu.matmul %37, %36, %cst_18 {dimension_numbers = #tpu.dot_dimension_numbers<[1], [0], [0], [1], [0, 0, 1, 1], [], []>} : vector<32x64xf32>, vector<64x128xf32>, vector<32x128xf32> -> vector<32x128xf32>
    %c0_19 = arith.constant 0 : index
    %c0_20 = arith.constant 0 : index
    %39 = vector.load %arg7[%c0_19, %c0_20] : memref<32x1xf32, #tpu.memory_space<vmem>>, vector<32x1xf32>
    %40 = vector.broadcast %39 : vector<32x1xf32> to vector<32x128xf32>
    %41 = arith.addf %38, %40 : vector<32x128xf32>
    %cst_21 = arith.constant 0.000000e+00 : f32
    %42 = vector.broadcast %cst_21 : f32 to vector<32x128xf32>
    %43 = arith.maximumf %41, %42 : vector<32x128xf32>
    %c0_22 = arith.constant 0 : index
    %c0_23 = arith.constant 0 : index
    %44 = vector.load %arg8[%c0_22, %c0_23] : memref<16x32xf32, #tpu.memory_space<vmem>>, vector<16x32xf32>
    %cst_24 = arith.constant dense<0.000000e+00> : vector<16x128xf32>
    %45 = tpu.matmul %44, %43, %cst_24 {dimension_numbers = #tpu.dot_dimension_numbers<[1], [0], [0], [1], [0, 0, 1, 1], [], []>} : vector<16x32xf32>, vector<32x128xf32>, vector<16x128xf32> -> vector<16x128xf32>
    %c0_25 = arith.constant 0 : index
    %c0_26 = arith.constant 0 : index
    %46 = vector.load %arg9[%c0_25, %c0_26] : memref<16x1xf32, #tpu.memory_space<vmem>>, vector<16x1xf32>
    %47 = vector.broadcast %46 : vector<16x1xf32> to vector<16x128xf32>
    %48 = arith.addf %45, %47 : vector<16x128xf32>
    %cst_27 = arith.constant 0.000000e+00 : f32
    %49 = vector.broadcast %cst_27 : f32 to vector<16x128xf32>
    %50 = arith.maximumf %48, %49 : vector<16x128xf32>
    %c0_28 = arith.constant 0 : index
    %c0_29 = arith.constant 0 : index
    %51 = vector.load %arg10[%c0_28, %c0_29] : memref<16x1xf32, #tpu.memory_space<vmem>>, vector<16x1xf32>
    %52 = vector.broadcast %51 : vector<16x1xf32> to vector<16x128xf32>
    %53 = arith.mulf %50, %52 : vector<16x128xf32>
    %cst_30 = arith.constant dense<0.000000e+00> : vector<128xf32>
    %54 = vector.multi_reduction <add>, %53, %cst_30 [0] : vector<16x128xf32> to vector<128xf32>
    %55 = vector.shape_cast %54 : vector<128xf32> to vector<1x128xf32>
    %56 = arith.addf %30, %55 : vector<1x128xf32>
    %c0_31 = arith.constant 0 : index
    %c0_32 = arith.constant 0 : index
    %57 = vector.load %arg13[%c0_31, %c0_32] : memref<1x128xf32, #tpu.memory_space<vmem>>, vector<1x128xf32>
    tpu.vector_store %arg13[%c0_31, %c0_32], %56 {strides = array<i32>} : memref<1x128xf32, #tpu.memory_space<vmem>>, vector<1x128xf32>,
    return
  }
  func.func @transform_0(%arg0: i32) -> (i32, i32) {
    %c0_i32 = arith.constant 0 : i32
    %c0_i32_0 = arith.constant 0 : i32
    return %c0_i32, %arg0 : i32, i32
  }
  func.func @transform_1(%arg0: i32) -> (i32, i32) {
    %c0_i32 = arith.constant 0 : i32
    %c0_i32_0 = arith.constant 0 : i32
    return %c0_i32, %arg0 : i32, i32
  }
  func.func @transform_2(%arg0: i32) -> (i32, i32) {
    %c0_i32 = arith.constant 0 : i32
    %c0_i32_0 = arith.constant 0 : i32
    return %c0_i32, %arg0 : i32, i32
  }
  func.func @transform_3(%arg0: i32) -> (i32, i32) {
    %c0_i32 = arith.constant 0 : i32
    %c0_i32_0 = arith.constant 0 : i32
    %c0_i32_1 = arith.constant 0 : i32
    return %c0_i32, %c0_i32_0 : i32, i32
  }
  func.func @transform_4(%arg0: i32) -> (i32, i32) {
    %c0_i32 = arith.constant 0 : i32
    %c0_i32_0 = arith.constant 0 : i32
    %c0_i32_1 = arith.constant 0 : i32
    return %c0_i32, %c0_i32_0 : i32, i32
  }
  func.func @transform_5(%arg0: i32) -> (i32, i32) {
    %c0_i32 = arith.constant 0 : i32
    %c0_i32_0 = arith.constant 0 : i32
    %c0_i32_1 = arith.constant 0 : i32
    return %c0_i32, %c0_i32_0 : i32, i32
  }
  func.func @transform_6(%arg0: i32) -> (i32, i32) {
    %c0_i32 = arith.constant 0 : i32
    %c0_i32_0 = arith.constant 0 : i32
    %c0_i32_1 = arith.constant 0 : i32
    return %c0_i32, %c0_i32_0 : i32, i32
  }
  func.func @transform_7(%arg0: i32) -> (i32, i32) {
    %c0_i32 = arith.constant 0 : i32
    %c0_i32_0 = arith.constant 0 : i32
    %c0_i32_1 = arith.constant 0 : i32
    return %c0_i32, %c0_i32_0 : i32, i32
  }
  func.func @transform_8(%arg0: i32) -> (i32, i32) {
    %c0_i32 = arith.constant 0 : i32
    %c0_i32_0 = arith.constant 0 : i32
    %c0_i32_1 = arith.constant 0 : i32
    return %c0_i32, %c0_i32_0 : i32, i32
  }
  func.func @transform_9(%arg0: i32) -> (i32, i32) {
    %c0_i32 = arith.constant 0 : i32
    %c0_i32_0 = arith.constant 0 : i32
    %c0_i32_1 = arith.constant 0 : i32
    return %c0_i32, %c0_i32_0 : i32, i32
  }
  func.func @transform_10(%arg0: i32) -> (i32, i32) {
    %c0_i32 = arith.constant 0 : i32
    %c0_i32_0 = arith.constant 0 : i32
    %c0_i32_1 = arith.constant 0 : i32
    return %c0_i32, %c0_i32_0 : i32, i32
  }
  func.func @transform_11(%arg0: i32) -> (i32, i32) {
    %c0_i32 = arith.constant 0 : i32
    %c0_i32_0 = arith.constant 0 : i32
    %c0_i32_1 = arith.constant 0 : i32
    return %c0_i32, %c0_i32_0 : i32, i32
  }
  func.func @transform_12(%arg0: i32) -> (i32, i32) {
    %c0_i32 = arith.constant 0 : i32
    %c0_i32_0 = arith.constant 0 : i32
    return %c0_i32, %arg0 : i32, i32
  }
}

</mosaic_0001>

<bundles_post_ra>
// kernel: ncf_forward.1
= control target key start
LH: loop header
LB: loop body
LE: loop exit
PB: predicated region body
PF: predicated region fallthrough
CT: control target
= control target key end

     0   :  { %s1407_s0 = inlined_call_operand.vmem [shape: s32[1,128], index: 0, kind: input, shape index: {}]   ;;  %s1408_s1 = inlined_call_operand.vmem [shape: s32[1,128], index: 1, kind: input, shape index: {}]   ;;  %s1409_s2 = inlined_call_operand.vmem [shape: f32[8,128], index: 2, kind: input, shape index: {}]   ;;  %s1410_s3 = inlined_call_operand.vmem [shape: f32[160,96], index: 3, kind: input, shape index: {}]   ;;  %s1411_s4 = inlined_call_operand.vmem [shape: f32[64,1], index: 4, kind: input, shape index: {}]   ;;  %s1412_s5 = inlined_call_operand.vmem [shape: f32[32,64], index: 5, kind: input, shape index: {}]   ;;  %s1413_s6 = inlined_call_operand.vmem [shape: f32[32,1], index: 6, kind: input, shape index: {}]   ;;  %s1414_s7 = inlined_call_operand.hbm [shape: f32[16,32], index: 7, kind: input, shape index: {}]   ;;  %s1415_s8 = inlined_call_operand.vmem [shape: f32[16,1], index: 8, kind: input, shape index: {}]   ;;  %s1416_s9 = inlined_call_operand.vmem [shape: f32[16,1], index: 9, kind: input, shape index: {}]   ;;  %s1417_s10 = inlined_call_operand.vmem [shape: f32[8,1], index: 10, kind: input, shape index: {}]   ;;  %s1418_s11 = inlined_call_operand.<no memory space> [shape: f32[1,1], index: 11, kind: input, shape index: {}]   ;;  %s1419_s12 = inlined_call_operand.vmem [shape: f32[1,128], index: 12, kind: output, shape index: {}]  }
   0x1   :  { %v17_v0 = vstv %s1418_s11 }
   0x2   :  { %18 = vst [vmem:[#allocation2] sm:$0x1] %v17_v0 }
   0x3   :  { %19 = vsyncpa [#allocation4], 0  ;;  %s1025_s23 = smov [#allocation3]   ;;  %s1001_s27 = scalar_lea.hbm %s1414_s7, 256 }
   0x4   :  { %s39_s24 = sshll.u32 %s1025_s23, 4  ;;  %p1002_p0 = scmp.ne.s32.totalorder %s1414_s7, %s1001_s27  ;;  %s40_s24 = int_to_ptr.vmem [resolvable:$true] %s39_s24 }
   0x5   :  { %p1005_p1 = scmp.lt.u32.totalorder %s1001_s27, %s1414_s7 }
   0x7   :  { %p1007_p2 = pnand %p1005_p1, %p1002_p0 }
   0x9   :  { %1010 = shalt.err (!%p1007_p2)
}
   0xa   :  { %s1011_s11 = scalar_lea.vmem %s40_s24, 256  ;;  %p1016_p4 = scmp.lt.s32.totalorder %s40_s24, %s40_s24 }
   0xb   :  { %p1012_p3 = scmp.ne.s32.totalorder %s40_s24, %s1011_s11  ;;  %p1017_p5 = scmp.lt.s32.totalorder %s1011_s11, %s1011_s11 }
   0xd   :  { %p1018_p6 = por %p1017_p5, %p1016_p4 }
   0xf   :  { %p1019_p7 = pnand %p1018_p6, %p1012_p3 }
  0x11   :  { %1022 = shalt.err (!%p1019_p7)
}
  0x12   :  { %s1026_s14 = smov 128   ;;  %s1027_s15 = smov 8  }
  0x13   :  { %45 = dma.hbm_to_vmem [thread:$0]  %s1414_s7, 256, %s40_s24, [#allocation4], %s1026_s14, %s1026_s14, %s1027_s15  }
  0x14   :  { %1023 = dma.done.wait [#allocation4], 256  }
  0x15   :  { %1024 = vsyncadd [#allocation4], 4294967040  ;;  %v57_v1 = vlaneseq  ;;  %v1028_v2 = vmov 0   ;;  %vm161_vm0 = vcmask 785408   ;;  %v1117_v6 = vld [vmem:[%s1407_s0] ss:$0 sm:$0xff] }
  0x16   :  { %999 = vset.pattern.permute.xlu0 %v1028_v2  ;;  %1000 = vset.pattern.permute.xlu1 %v1028_v2  ;;  %v71_v7 = vld [vmem:[%s1408_s1] sm:$0x1]  ;;  %v1029_v18 = vmov 1.0|1.0   ;;  %v432_v21 = vld [vmem:[%s1411_s4 + $0x10] sm:$0xff]  ;;  %v431_v23 = vld [vmem:[%s1411_s4 + $0x8] sm:$0xff] }
  0x17   :  { %v1110_v3 = vshrl.u32 %v57_v1, 7  ;;  %v141_v8 = vld [vmem:[%s1410_s3] sm:$0xff]  ;;  %v72_v9 = vadd.s32 32, %v71_v7  ;;  %450 = vperm.xlu1 %1000, %v432_v21   ;;  %v433_v25 = vld [vmem:[%s1411_s4 + $0x18] sm:$0xff]  ;;  %v435_v33 = vld [vmem:[%s1411_s4 + $0x28] sm:$0xff] }
  0x18   :  { %875 = vmatprep.mubr.msk.f32.mxu0 %vm161_vm0, %v141_v8  ;;  %v430_v17 = vld [vmem:[%s1411_s4] sm:$0xff]  ;;  %v436_v36 = vld [vmem:[%s1411_s4 + $0x30] sm:$0xff]  ;;  %v437_v38 = vld [vmem:[%s1411_s4 + $0x38] sm:$0xff] }
  0x19   :  { %v91_v4 = vsub.s32 0, %v1110_v3  ;;  %v59_v5 = vadd.s32 8, %v1110_v3  ;;  %v60_v10 = vadd.s32 16, %v1110_v3  ;;  %vm77_vm1 = vcmp.eq.s32.totalorder %v1110_v3, %v1117_v6  ;;  %440 = vperm.xlu0 %999, %v430_v17   ;;  %v434_v30 = vld [vmem:[%s1411_s4 + $0x20] sm:$0xff]  ;;  %v499_v41 = vld [vmem:[%s1413_s6 + $0x8] sm:$0xff]  ;;  %v500_v42 = vld [vmem:[%s1413_s6 + $0x10] sm:$0xff] }
  0x1a   :  { %v61_v12 = vadd.s32 24, %v1110_v3  ;;  %v62_v13 = vadd.s32 32, %v1110_v3  ;;  %v63_v15 = vadd.s32 40, %v1110_v3  ;;  %v64_v16 = vadd.s32 48, %v1110_v3  ;;  %v498_v40 = vld [vmem:[%s1413_s6] sm:$0xff]  ;;  %v501_v43 = vld [vmem:[%s1413_s6 + $0x18] sm:$0xff] }
  0x1b   :  { %v1131_v11 = vrot.slane %v72_v9, %v91_v4  ;;  %vm78_vm2 = vcmp.eq.s32.totalorder %v59_v5, %v1117_v6  ;;  %vm79_vm6 = vcmp.eq.s32.totalorder %v60_v10, %v1117_v6  ;;  %v65_v20 = vadd.s32 56, %v1110_v3  ;;  %455 = vperm.xlu1 %1000, %v433_v25   ;;  %v142_v44 = vld [vmem:[%s1410_s3 + $0x8] sm:$0xff]  ;;  %v626_v45 = vld [vmem:[%s1415_s8] sm:$0xff]  ;;  %v143_v46 = vld [vmem:[%s1410_s3 + $0x10] sm:$0xff] }
  0x1c   :  { %vm80_vm9 = vcmp.eq.s32.totalorder %v61_v12, %v1117_v6  ;;  %vm81_vm13 = vcmp.eq.s32.totalorder %v62_v13, %v1117_v6  ;;  %v66_v24 = vadd.s32 64, %v1110_v3  ;;  %v67_v27 = vadd.s32 72, %v1110_v3  ;;  %v627_v47 = vld [vmem:[%s1415_s8 + $0x8] sm:$0xff]  ;;  %v144_v48 = vld [vmem:[%s1410_s3 + $0x18] sm:$0xff]  ;;  %v397_v49 = vld [vmem:[%s1417_s10] sm:$0xff] }
  0x1d   :  { %vm93_vm3 = vcmp.eq.s32.totalorder %v1110_v3, %v1131_v11  ;;  %vm94_vm4 = vcmp.eq.s32.totalorder %v59_v5, %v1131_v11  ;;  %vm95_vm7 = vcmp.eq.s32.totalorder %v60_v10, %v1131_v11  ;;  %vm96_vm10 = vcmp.eq.s32.totalorder %v61_v12, %v1131_v11  ;;  %445 = vperm.xlu0 %999, %v431_v23   ;;  %v145_v50 = vld [vmem:[%s1410_s3 + $0x20] sm:$0xff]  ;;  %v146_v52 = vld [vmem:[%s1410_s3 + $0x28] sm:$0xff]  ;;  %v147_v54 = vld [vmem:[%s1410_s3 + $0x30] sm:$0xff] }
  0x1e   :  { %vm1139_vm5 = vmor %vm77_vm1, %vm93_vm3  ;;  %vm97_vm14 = vcmp.eq.s32.totalorder %v62_v13, %v1131_v11  ;;  %vm82_vm1 = vcmp.eq.s32.totalorder %v63_v15, %v1117_v6  ;;  %v68_v29 = vadd.s32 80, %v1110_v3  ;;  %v69_v32 = vadd.s32 88, %v1110_v3  ;;  %v722_v51 = vld [vmem:[%s1416_s9] sm:$0xff]  ;;  %v723_v53 = vld [vmem:[%s1416_s9 + $0x8] sm:$0xff] }
  0x1f   :  { %vm106_vm8 = vmor %vm78_vm2, %vm94_vm4  ;;  %vm98_vm2 = vcmp.eq.s32.totalorder %v63_v15, %v1131_v11  ;;  %465 = vperm.xlu1 %1000, %v435_v33   ;;  %v411_v55 = vld [vmem:[#allocation2] sm:$0x1]  ;;  %v148_v56 = vld [vmem:[%s1410_s3 + $0x38] sm:$0xff] }
  0x20   :  { %vm938_vm11 = vmpackc.low %vm106_vm8, %vm1139_vm5  ;;  %vm83_vm5 = vcmp.eq.s32.totalorder %v64_v16, %v1117_v6  ;;  %vm84_vm8 = vcmp.eq.s32.totalorder %v65_v20, %v1117_v6  ;;  %v149_v57 = vld [vmem:[%s1410_s3 + $0x40] sm:$0xff]  ;;  %v150_v58 = vld [vmem:[%s1410_s3 + $0x48] sm:$0xff] }
  0x21   :  { %939 = vmatprep.subr.msk.bf16.mxu0 %vm938_vm11, %v1029_v18  ;;  %vm1155_vm12 = vmor %vm79_vm6, %vm95_vm7  ;;  %vm99_vm6 = vcmp.eq.s32.totalorder %v64_v16, %v1131_v11  ;;  %460 = vperm.xlu0 %999, %v434_v30   ;;  %v151_v59 = vld [vmem:[%s1410_s3 + $0x50] sm:$0xff]  ;;  %v152_v60 = vld [vmem:[%s1410_s3 + $0x58] sm:$0xff] }
  0x22   :  { %941 = vmatpush3.bf16.msk.msra.mxu0 %vm938_vm11, %v1029_v18  ;;  %vm1166_vm15 = vmor %vm80_vm9, %vm96_vm10  ;;  %vm100_vm9 = vcmp.eq.s32.totalorder %v65_v20, %v1131_v11  ;;  %v153_v61 = vld [vmem:[%s1410_s3 + $0x60] sm:$0xff]  ;;  %v154_v62 = vld [vmem:[%s1410_s3 + $0x68] sm:$0xff] }
  0x23   :  { %vm942_vm3 = vmpackc.low %vm1166_vm15, %vm1155_vm12  ;;  %vm85_vm12 = vcmp.eq.s32.totalorder %v66_v24, %v1117_v6  ;;  %vm86_vm15 = vcmp.eq.s32.totalorder %v67_v27, %v1117_v6  ;;  %475 = vperm.xlu1 %1000, %v437_v38   ;;  %v155_v63 = vld [vmem:[%s1410_s3 + $0x70] sm:$0xff]  ;;  %v156_v0 = vld [vmem:[%s1410_s3 + $0x78] sm:$0xff] }
  0x24   :  { %943 = vmatprep.subr.msk.bf16.mxu0 %vm942_vm3, %v1029_v18  ;;  %vm1186_vm4 = vmor %vm81_vm13, %vm97_vm14  ;;  %vm101_vm13 = vcmp.eq.s32.totalorder %v66_v24, %v1131_v11  ;;  %v157_v1 = vld [vmem:[%s1410_s3 + $0x80] sm:$0xff]  ;;  %v158_v2 = vld [vmem:[%s1410_s3 + $0x88] sm:$0xff] }
  0x25   :  { %vm1193_vm7 = vmor %vm82_vm1, %vm98_vm2  ;;  %vm102_vm1 = vcmp.eq.s32.totalorder %v67_v27, %v1131_v11  ;;  %470 = vperm.xlu0 %999, %v436_v36   ;;  %v159_v5 = vld [vmem:[%s1410_s3 + $0x90] sm:$0xff]  ;;  %v494_v7 = vld [vmem:[%s1412_s5] sm:$0xff] }
  0x26   :  { %945 = vmatpush3.bf16.msk.msra.mxu0 %vm942_vm3, %v1029_v18  ;;  %vm946_vm10 = vmpackc.low %vm1193_vm7, %vm1186_vm4  ;;  %vm87_vm4 = vcmp.eq.s32.totalorder %v68_v29, %v1117_v6  ;;  %vm88_vm7 = vcmp.eq.s32.totalorder %v69_v32, %v1117_v6  ;;  %v160_v6 = vld [vmem:[%s1410_s3 + $0x98] sm:$0xff] }
  0x27   :  { %947 = vmatprep.subr.msk.bf16.mxu0 %vm946_vm10, %v1029_v18  ;;  %vm1209_vm11 = vmor %vm83_vm5, %vm99_vm6  ;;  %vm103_vm5 = vcmp.eq.s32.totalorder %v68_v29, %v1131_v11  ;;  %509 = vperm.xlu1 %1000, %v499_v41  }
  0x28   :  { %vm1219_vm14 = vmor %vm84_vm8, %vm100_vm9  ;;  %vm104_vm8 = vcmp.eq.s32.totalorder %v69_v32, %v1131_v11 }
  0x29   :  { %vm950_vm2 = vmpackc.low %vm1219_vm14, %vm1209_vm11  ;;  %504 = vperm.xlu0 %999, %v498_v40   ;;  %vm522_vm11 = vcmask 523264  }
  0x2a   :  { %949 = vmatpush3.bf16.msk.msra.mxu0 %vm946_vm10, %v1029_v18  ;;  %vm1230_vm3 = vmor %vm85_vm12, %vm101_vm13  ;;  %921 = vmatprep.mubr.msk.f32.mxu1 %vm522_vm11, %v494_v7 }
  0x2b   :  { %951 = vmatprep.subr.msk.bf16.mxu0 %vm950_vm2, %v1029_v18  ;;  %vm1245_vm6 = vmor %vm86_vm15, %vm102_vm1  ;;  %519 = vperm.xlu1 %1000, %v501_v43  }
  0x2c   :  { %vm954_vm9 = vmpackc.low %vm1245_vm6, %vm1230_vm3 }
  0x2d   :  { %vm1258_vm10 = vmor %vm87_vm4, %vm103_vm5  ;;  %514 = vperm.xlu0 %999, %v500_v42  }
  0x2e   :  { %953 = vmatpush3.bf16.msk.msra.mxu0 %vm950_vm2, %v1029_v18  ;;  %vm116_vm12 = vmor %vm88_vm7, %vm104_vm8 }
  0x2f   :  { %955 = vmatprep.subr.msk.bf16.mxu0 %vm954_vm9, %v1029_v18  ;;  %vm958_vm13 = vmpackc.low %vm116_vm12, %vm1258_vm10  ;;  %635 = vperm.xlu1 %1000, %v627_v47  }
  0x31   :  { %630 = vperm.xlu0 %999, %v626_v45  }
  0x32   :  { %957 = vmatpush3.bf16.msk.msra.mxu0 %vm954_vm9, %v1029_v18 }
  0x33   :  { %959 = vmatprep.subr.msk.bf16.mxu0 %vm958_vm13, %v1029_v18  ;;  %726 = vperm.xlu1 %1000, %v722_v51   ;;  %v495_v51 = vld [vmem:[%s1412_s5 + $0x8] sm:$0xff] }
  0x35   :  { %400 = vperm.xlu0 %999, %v397_v49  }
  0x36   :  { %961 = vmatpush3.bf16.msk.msra.mxu0 %vm958_vm13, %v1029_v18 }
  0x37   :  { %414 = vperm.xlu1 %1000, %v411_v55  }
  0x39   :  { %876 = vmatmul.mubr.msk.f32.vlgmr.msra.gmra.mrb[0].mxu0 %vm161_vm0, %v142_v44  ;;  %731 = vperm.xlu0 %999, %v723_v53   ;;  %v497_v53 = vld [vmem:[%s1412_s5 + $0x18] sm:$0xff] }
  0x3a   :  { %878 = vmatprep.mubr.msk.f32.mxu0 %vm161_vm0, %v143_v46 }
  0x3d   :  { %879 = vmatmul.mubr.msk.f32.gmra.mrb[2].mxu0 %vm161_vm0, %v144_v48 }
  0x3e   :  { %881 = vmatprep.mubr.msk.f32.mxu0 %vm161_vm0, %v145_v50 }
  0x41   :  { %882 = vmatmul.mubr.msk.f32.gmra.mrb[4].mxu0 %vm161_vm0, %v146_v52  ;;  %v496_v52 = vld [vmem:[%s1412_s5 + $0x10] sm:$0xff] }
  0x42   :  { %884 = vmatprep.mubr.msk.f32.mxu0 %vm161_vm0, %v147_v54  ;;  %v624_v54 = vld [vmem:[#allocation3] sm:$0xff] }
  0x45   :  { %885 = vmatmul.mubr.msk.f32.gmra.mrb[6].mxu0 %vm161_vm0, %v148_v56 }
  0x46   :  { %887 = vmatprep.mubr.msk.f32.mxu0 %vm161_vm0, %v149_v57 }
  0x49   :  { %888 = vmatmul.mubr.msk.f32.gmra.mrb[8].mxu0 %vm161_vm0, %v150_v58 }
  0x4a   :  { %890 = vmatprep.mubr.msk.f32.mxu0 %vm161_vm0, %v151_v59 }
  0x4d   :  { %891 = vmatmul.mubr.msk.f32.gmra.mrb[10].mxu0 %vm161_vm0, %v152_v60 }
  0x4e   :  { %893 = vmatprep.mubr.msk.f32.mxu0 %vm161_vm0, %v153_v61 }
  0x51   :  { %894 = vmatmul.mubr.msk.f32.gmra.mrb[2].mxu0 %vm161_vm0, %v154_v62 }
  0x52   :  { %896 = vmatprep.mubr.msk.f32.mxu0 %vm161_vm0, %v155_v63 }
  0x55   :  { %897 = vmatmul.mubr.msk.f32.gmra.mrb[4].mxu0 %vm161_vm0, %v156_v0 }
  0x56   :  { %899 = vmatprep.mubr.msk.f32.mxu0 %vm161_vm0, %v157_v1 }
  0x59   :  { %900 = vmatmul.mubr.msk.f32.gmra.mrb[6].mxu0 %vm161_vm0, %v158_v2 }
  0x5a   :  { %902 = vmatprep.mubr.msk.f32.mxu0 %vm161_vm0, %v159_v5 }
  0x5d   :  { %903 = vmatmul.mubr.msk.f32.gmra.mrb[8].mxu0 %vm161_vm0, %v160_v6  ;;  %vm638_vm0 = vcmask 261120  }
  0x96   :  { %v451_v11 = vpop.permute.xlu1 %450 }
  0x98   :  { %v441_v10 = vpop.permute.xlu0 %440 }
  0x9a   :  { %v456_v17 = vpop.permute.xlu1 %455 }
  0x9c   :  { %v446_v16 = vpop.permute.xlu0 %445 }
  0x9e   :  { %v466_v28 = vpop.permute.xlu1 %465 }
  0xa0   :  { %v461_v31 = vpop.permute.xlu0 %460 }
  0xa2   :  { %v476_v40 = vpop.permute.xlu1 %475 }
  0xa4   :  { %v471_v43 = vpop.permute.xlu0 %470 }
  0xa6   :  { %v510_v55 = vpop.permute.xlu1 %509 }
  0xa8   :  { %v505_v56 = vpop.permute.xlu0 %504 }
  0xaa   :  { %v520_v62 = vpop.permute.xlu1 %519 }
  0xac   :  { %v515_v1 = vpop.permute.xlu0 %514 }
 0x10c   :  { %v877_v8 = vpop.f32.mrb[0].mxu0 }
 0x10d   :  { %v288_v9 = vpop.f32.mrb[1].mxu0 }
 0x120   :  { %v892_v12 = vpop.f32.mrb[10].mxu0 }
 0x121   :  { %v388_v13 = vmul.f32 %v892_v12, %v877_v8  ;;  %v338_v14 = vpop.f32.mrb[11].mxu0  ;;  %v631_v12 = vpop.permute.xlu0 %630 }
 0x122   :  { %v387_v15 = vmul.f32 %v338_v14, %v288_v9  ;;  %v396_v14 = vld [vmem:[%s1409_s2] sm:$0xff] }
 0x124   :  { %v1381_v18 = vadd.f32 %v388_v13, %v387_v15  ;;  %v895_v19 = vpop.f32.mrb[2].mxu0 }
 0x125   :  { %v479_v20 = vadd.f32 %v895_v19, %v446_v16  ;;  %v348_v21 = vpop.f32.mrb[3].mxu0  ;;  %v401_v13 = vpop.permute.xlu0 %400 }
 0x126   :  { %v478_v22 = vadd.f32 %v441_v10, %v348_v21  ;;  %v403_v15 = vmul.f32 %v401_v13, %v396_v14  ;;  %v390_v16 = vrot.slane %v1381_v18, 4  ;;  %v636_v21 = vpop.permute.xlu1 %635 }
 0x127   :  { %v487_v23 = vmax.f32 %v479_v20, 0.0 }
 0x128   :  { %v486_v24 = vmax.f32 %v478_v22, 0.0  ;;  %v898_v25 = vpop.f32.mrb[4].mxu0  ;;  %v391_v19 = vadd.f32 %v390_v16, %v1381_v18 }
 0x129   :  { %v481_v26 = vadd.f32 %v898_v25, %v456_v17  ;;  %v358_v27 = vpop.f32.mrb[5].mxu0  ;;  %v404_v17 = vrot.slane %v403_v15, 4 }
 0x12a   :  { %v480_v29 = vadd.f32 %v451_v11, %v358_v27  ;;  %v962_v30 = vpack.c.bf16 %v487_v23, %v486_v24  ;;  %v625_v11 = vld [vmem:[#allocation3 + $0x8] sm:$0xff]  ;;  %v392_v22 = vrot.slane %v391_v19, 2 }
 0x12b   :  { %v489_v32 = vmax.f32 %v481_v26, 0.0  ;;  %v405_v20 = vadd.f32 %v404_v17, %v403_v15 }
 0x12c   :  { %v488_v33 = vmax.f32 %v480_v29, 0.0  ;;  %v901_v34 = vpop.f32.mrb[6].mxu0  ;;  %963 = vmatprep.subr.bf16.mxu1 %v962_v30  ;;  %v732_v29 = vpop.permute.xlu0 %731 }
 0x12d   :  { %v483_v35 = vadd.f32 %v901_v34, %v466_v28  ;;  %v368_v36 = vpop.f32.mrb[7].mxu0  ;;  %965 = vmatpush3.bf16.msra.mxu1 %v962_v30  ;;  %v406_v26 = vrot.slane %v405_v20, 2  ;;  %v393_v30 = vadd.f32 %v392_v22, %v391_v19 }
 0x12e   :  { %v966_v37 = vpack.c.bf16 %v489_v32, %v488_v33  ;;  %v482_v38 = vadd.f32 %v461_v31, %v368_v36  ;;  %v727_v32 = vpop.permute.xlu1 %726 }
 0x12f   :  { %v491_v39 = vmax.f32 %v483_v35, 0.0  ;;  %v407_v34 = vadd.f32 %v406_v26, %v405_v20  ;;  %v394_v36 = vrot.slane %v393_v30, 1 }
 0x130   :  { %v490_v41 = vmax.f32 %v482_v38, 0.0  ;;  %v904_v42 = vpop.f32.mrb[8].mxu0  ;;  %967 = vmatprep.subr.bf16.mxu1 %v966_v37 }
 0x131   :  { %v485_v44 = vadd.f32 %v904_v42, %v476_v40  ;;  %v378_v45 = vpop.f32.mrb[9].mxu0  ;;  %969 = vmatpush3.bf16.msra.mxu1 %v966_v37  ;;  %v408_v38 = vrot.slane %v407_v34, 1 }
 0x132   :  { %v970_v46 = vpack.c.bf16 %v491_v39, %v490_v41  ;;  %v484_v47 = vadd.f32 %v471_v43, %v378_v45  ;;  %v395_v39 = vadd.f32 %v394_v36, %v393_v30  ;;  %v415_v43 = vpop.permute.xlu1 %414 }
 0x133   :  { %v493_v48 = vmax.f32 %v485_v44, 0.0  ;;  %v409_v41 = vadd.f32 %v408_v38, %v407_v34 }
 0x134   :  { %v492_v49 = vmax.f32 %v484_v47, 0.0  ;;  %971 = vmatprep.subr.bf16.mxu1 %v970_v46 }
 0x135   :  { %973 = vmatpush3.bf16.msra.mxu1 %v970_v46  ;;  %v410_v44 = vadd.f32 %v409_v41, %v395_v39  ;;  %v420_v46 = vrot.slane %v415_v43, %v91_v4 }
 0x136   :  { %v974_v50 = vpack.c.bf16 %v493_v48, %v492_v49 }
 0x137   :  { %v421_v48 = vadd.f32 %v420_v46, %v410_v44 }
 0x138   :  { %975 = vmatprep.subr.bf16.mxu1 %v974_v50 }
 0x139   :  { %977 = vmatpush3.bf16.msra.mxu1 %v974_v50 }
 0x13c   :  { %922 = vmatmul.mubr.msk.f32.vlgmr.msra.gmra.mrb[0].mxu1 %vm522_vm11, %v495_v51 }
 0x13d   :  { %924 = vmatprep.mubr.msk.f32.mxu1 %vm522_vm11, %v496_v52 }
 0x140   :  { %925 = vmatmul.mubr.msk.f32.gmra.mrb[2].mxu1 %vm522_vm11, %v497_v53 }
 0x141   :  { %935 = vmatprep.mubr.msk.f32.mxu1 %vm638_vm0, %v624_v54 }
 0x20f   :  { %v923_v57 = vpop.f32.mrb[0].mxu1 }
 0x210   :  { %v607_v58 = vadd.f32 %v923_v57, %v510_v55  ;;  %v601_v59 = vpop.f32.mrb[1].mxu1 }
 0x211   :  { %v602_v60 = vadd.f32 %v601_v59, %v505_v56 }
 0x212   :  { %v621_v61 = vmax.f32 %v607_v58, 0.0 }
 0x213   :  { %v620_v63 = vmax.f32 %v602_v60, 0.0  ;;  %v926_v0 = vpop.f32.mrb[2].mxu1 }
 0x214   :  { %v617_v2 = vadd.f32 %v926_v0, %v520_v62  ;;  %v611_v5 = vpop.f32.mrb[3].mxu1 }
 0x215   :  { %v978_v6 = vpack.c.bf16 %v621_v61, %v620_v63  ;;  %v612_v7 = vadd.f32 %v611_v5, %v515_v1 }
 0x216   :  { %v623_v8 = vmax.f32 %v617_v2, 0.0 }
 0x217   :  { %v622_v9 = vmax.f32 %v612_v7, 0.0  ;;  %979 = vmatprep.subr.bf16.mxu1 %v978_v6 }
 0x218   :  { %981 = vmatpush3.bf16.msra.mxu1 %v978_v6 }
 0x219   :  { %v982_v10 = vpack.c.bf16 %v623_v8, %v622_v9 }
 0x21b   :  { %983 = vmatprep.subr.bf16.mxu1 %v982_v10 }
 0x21c   :  { %985 = vmatpush3.bf16.msra.mxu1 %v982_v10 }
 0x21f   :  { %936 = vmatmul.mubr.msk.f32.vlgmr.msra.gmra.mrb[4].mxu1 %vm638_vm0, %v625_v11 }
 0x2f2   :  { %v937_v23 = vpop.f32.mrb[4].mxu1 }
 0x2f3   :  { %v717_v24 = vadd.f32 %v937_v23, %v636_v21  ;;  %v711_v25 = vpop.f32.mrb[5].mxu1 }
 0x2f4   :  { %v712_v27 = vadd.f32 %v711_v25, %v631_v12 }
 0x2f5   :  { %v721_v28 = vmax.f32 %v717_v24, 0.0 }
 0x2f6   :  { %v720_v31 = vmax.f32 %v712_v27, 0.0 }
 0x2f7   :  { %v735_v33 = vmul.f32 %v732_v29, %v721_v28 }
 0x2f8   :  { %v734_v35 = vmul.f32 %v727_v32, %v720_v31 }
 0x2fa   :  { %v736_v37 = vadd.f32 %v735_v33, %v734_v35 }
 0x2fc   :  { %v737_v18 = vrot.slane %v736_v37, 4 }
 0x2fe   :  { %v738_v40 = vadd.f32 %v737_v18, %v736_v37 }
 0x300   :  { %v739_v42 = vrot.slane %v738_v40, 2 }
 0x302   :  { %v740_v45 = vadd.f32 %v739_v42, %v738_v40 }
 0x304   :  { %v741_v47 = vrot.slane %v740_v45, 1 }
 0x306   :  { %v742_v49 = vadd.f32 %v741_v47, %v740_v45 }
 0x308   :  { %v743_v50 = vadd.f32 %v742_v49, %v421_v48 }
 0x30a   :  { %744 = vst [vmem:[%s1419_s12] sm:$0x1] %v743_v50 }
 0x30b   :  { %749 = vsyncpa [#allocation4], 1 }

</bundles_post_ra>
